<compile_context>
chip_gen: v7x
topology: tpu7x:2x2x1
jax: 0.10.0
libtpu: 0.0.40
codegen_flags: <defaults>
</compile_context>

<pallas_src>
import numpy as np
import jax
import jax.numpy as jnp
from jax.experimental import pallas as pl
from jax.experimental.pallas import tpu as pltpu


def _drop_path_kernel(scale_ref, x_ref, o_ref):
    # scale_ref: VMEM (TB, 1, 1) f32 -- per-sample keep/drop scale (0 or 1/keep_prob).
    # x_ref:     VMEM (TB, TR, LANE) activation tile.
    # o_ref:     VMEM (TB, TR, LANE) output tile.
    o_ref[...] = x_ref[...] * scale_ref[...].astype(o_ref.dtype)


def drop_path_forward(x, drop_prob, *, training, key=None,
                      target_block_bytes=1 << 20):
    """Pallas implementation of DropPath.forward() for (B, ...) activations."""
    # Identity path: matches PyTorch `if drop_prob == 0. or not self.training`.
    if drop_prob == 0.0 or not training:
        return x
    if key is None:
        raise ValueError("A PRNG key is required when training with drop_prob > 0.")

    orig_shape = x.shape
    B = int(orig_shape[0])
    L = 1
    for d in orig_shape[1:]:
        L *= int(d)
    keep_prob = 1.0 - float(drop_prob)
    dsize = x.dtype.itemsize

    # Per-sample Bernoulli keep decision folded with 1/keep_prob into one f32
    # scale per sample (plain-JAX glue, same randomness as the PyTorch module).
    rand = jax.random.uniform(key, (B,), dtype=jnp.float32)
    scale = (jnp.floor(keep_prob + rand) * (1.0 / keep_prob)).reshape(B, 1, 1)

    # ---- Lane-dense per-sample layout: (rows, LANE), LANE a big multiple of 128.
    if L % 128 == 0:
        lane = 128
        while (L % (lane * 2) == 0) and (lane * 2 * dsize <= target_block_bytes):
            lane *= 2
        rows = L // lane
    else:
        # TODO(synk): odd trailing sizes fall back to one full-width row per
        # sample (only the final <128-lane group gets masked stores).
        lane = L
        rows = 1

    # ---- Row tile (sublane axis): multiple of 8 (or full), ~target bytes/block.
    max_tr = max(1, target_block_bytes // (lane * dsize))
    if rows <= max_tr:
        tr = rows
    elif max_tr >= 8:
        tr = (max_tr // 8) * 8
    else:
        tr = min(8, rows)

    # ---- Pack several samples per block when a single sample is small.
    if tr == rows:
        tb = min(B, max(1, target_block_bytes // max(1, rows * lane * dsize)))
    else:
        tb = 1

    x3 = x.reshape(B, rows, lane)
    grid = (pl.cdiv(B, tb), pl.cdiv(rows, tr))

    out3 = pl.pallas_call(
        _drop_path_kernel,
        out_shape=jax.ShapeDtypeStruct((B, rows, lane), x.dtype),
        grid=grid,
        in_specs=[
            pl.BlockSpec((tb, 1, 1), lambda b, r: (b, 0, 0)),      # per-sample scale
            pl.BlockSpec((tb, tr, lane), lambda b, r: (b, r, 0)),  # activations
        ],
        out_specs=pl.BlockSpec((tb, tr, lane), lambda b, r: (b, r, 0)),
        compiler_params=pltpu.CompilerParams(
            dimension_semantics=("parallel", "parallel"),
            # ~1 MiB blocks x (in + out) x double-buffer << 32 MiB; 32 MiB is
            # within the scoped/physical VMEM of v5e, v6e and v7x.
            vmem_limit_bytes=32 * 1024 * 1024,
        ),
    )(scale, x3)

    return out3.reshape(orig_shape)


def _reference(x, drop_prob, key):
    """Pure-JAX reference of the exact PyTorch drop_path semantics."""
    keep_prob = 1.0 - drop_prob
    B = x.shape[0]
    rand = jax.random.uniform(key, (B,), dtype=jnp.float32)
    random_tensor = jnp.floor(keep_prob + rand)                  # (B,) of 0/1
    bshape = (B,) + (1,) * (x.ndim - 1)
    return x / keep_prob * random_tensor.reshape(bshape)


if __name__ == "__main__":
    drop_prob = 0.25
    key = jax.random.PRNGKey(0)
    kx, kmask, kx2, kmask2 = jax.random.split(key, 4)

    # Main ViT-token-like case: batch=4, seq=16, hidden=32 (lane-dense after
    # flattening: each sample becomes one 512-lane row, whole tensor = 1 block).
    B, N, C = 4, 16, 32
    x = jax.random.normal(kx, (B, N, C), dtype=jnp.float32)
    out = jax.block_until_ready(drop_path_forward(x, drop_prob, training=True, key=kmask))
    ref = _reference(x, drop_prob, kmask)
    assert out.shape == x.shape, out.shape
    np.testing.assert_allclose(np.asarray(out), np.asarray(ref), rtol=1e-5, atol=1e-5)

    # Odd-shaped fallback path (trailing size not a multiple of 128).
    x_odd = jax.random.normal(kx2, (2, 5, 7), dtype=jnp.float32)
    out_odd = jax.block_until_ready(
        drop_path_forward(x_odd, drop_prob, training=True, key=kmask2))
    ref_odd = _reference(x_odd, drop_prob, kmask2)
    np.testing.assert_allclose(np.asarray(out_odd), np.asarray(ref_odd),
                               rtol=1e-5, atol=1e-5)

    # Eval-mode / p=0 path must be the identity (no kernel launch).
    out_eval = drop_path_forward(x, drop_prob, training=False)
    np.testing.assert_allclose(np.asarray(out_eval), np.asarray(x))
    out_p0 = drop_path_forward(x, 0.0, training=True, key=kmask)
    np.testing.assert_allclose(np.asarray(out_p0), np.asarray(x))

    print("KERNEL_OK")
</pallas_src>

<mosaic_0001>
module attributes {stable_mosaic.version = 11 : i64} {
  func.func @_drop_path_kernel(%arg0: i32, %arg1: i32, %arg2: memref<4x1x1xf32, #tpu.memory_space<vmem>>, %arg3: memref<4x1x512xf32, #tpu.memory_space<vmem>>, %arg4: memref<4x1x512xf32, #tpu.memory_space<vmem>>) attributes {dimension_semantics = [#tpu.dimension_semantics<parallel>, #tpu.dimension_semantics<parallel>], iteration_bounds = array<i64: 1, 1>, scalar_prefetch = 0 : i64, scratch_operands = 0 : i64, tpu.core_type = #tpu.core_type<tc>, window_params = [{transform_indices = @transform_0, window_bounds = array<i64: 4, 1, 1>}, {transform_indices = @transform_1, window_bounds = array<i64: 4, 1, 512>}, {transform_indices = @transform_2, window_bounds = array<i64: 4, 1, 512>}]} {
    %c0 = arith.constant 0 : index
    %c0_0 = arith.constant 0 : index
    %c0_1 = arith.constant 0 : index
    %0 = vector.load %arg3[%c0, %c0_0, %c0_1] : memref<4x1x512xf32, #tpu.memory_space<vmem>>, vector<4x1x512xf32>
    %c0_2 = arith.constant 0 : index
    %c0_3 = arith.constant 0 : index
    %c0_4 = arith.constant 0 : index
    %1 = vector.load %arg2[%c0_2, %c0_3, %c0_4] : memref<4x1x1xf32, #tpu.memory_space<vmem>>, vector<4x1x1xf32>
    %2 = vector.broadcast %1 : vector<4x1x1xf32> to vector<4x1x512xf32>
    %3 = arith.mulf %0, %2 : vector<4x1x512xf32>
    %c0_5 = arith.constant 0 : index
    %c0_6 = arith.constant 0 : index
    %c0_7 = arith.constant 0 : index
    %4 = vector.load %arg4[%c0_5, %c0_6, %c0_7] : memref<4x1x512xf32, #tpu.memory_space<vmem>>, vector<4x1x512xf32>
    tpu.vector_store %arg4[%c0_5, %c0_6, %c0_7], %3 {strides = array<i32>} : memref<4x1x512xf32, #tpu.memory_space<vmem>>, vector<4x1x512xf32>,
    return
  }
  func.func @transform_0(%arg0: i32, %arg1: i32) -> (i32, i32, i32) {
    %c0_i32 = arith.constant 0 : i32
    %c0_i32_0 = arith.constant 0 : i32
    %c0_i32_1 = arith.constant 0 : i32
    return %arg0, %c0_i32, %c0_i32_0 : i32, i32, i32
  }
  func.func @transform_1(%arg0: i32, %arg1: i32) -> (i32, i32, i32) {
    %c0_i32 = arith.constant 0 : i32
    %c0_i32_0 = arith.constant 0 : i32
    return %arg0, %arg1, %c0_i32 : i32, i32, i32
  }
  func.func @transform_2(%arg0: i32, %arg1: i32) -> (i32, i32, i32) {
    %c0_i32 = arith.constant 0 : i32
    %c0_i32_0 = arith.constant 0 : i32
    return %arg0, %arg1, %c0_i32 : i32, i32, i32
  }
}

</mosaic_0001>

<bundles_post_ra>
// kernel: tpu_custom_call.1
= control target key start
LH: loop header
LB: loop body
LE: loop exit
PB: predicated region body
PF: predicated region fallthrough
CT: control target
= control target key end

     0   :  { %7 = vsyncpa [#allocation3], 0  ;;  %s228_s0 = inlined_call_operand.vmem [shape: f32[4,1,1], index: 0, kind: input, shape index: {}]   ;;  %s229_s1 = inlined_call_operand.hbm [shape: f32[4,1,512], index: 1, kind: input, shape index: {}]   ;;  %s230_s2 = inlined_call_operand.hbm [shape: f32[4,1,512], index: 2, kind: output, shape index: {}]  }
   0x1   :  { %8 = vsyncpa [#allocation4], 0  ;;  %s154_s9 = smov [#allocation2]   ;;  %s106_s13 = scalar_lea.hbm %s229_s1, 256 }
   0x2   :  { %s16_s10 = sshll.u32 %s154_s9, 4  ;;  %p107_p0 = scmp.ne.s32.totalorder %s229_s1, %s106_s13  ;;  %s17_s10 = int_to_ptr.vmem [resolvable:$true] %s16_s10 }
   0x3   :  { %p110_p1 = scmp.lt.u32.totalorder %s106_s13, %s229_s1 }
   0x5   :  { %p112_p2 = pnand %p110_p1, %p107_p0 }
   0x7   :  { %115 = shalt.err (!%p112_p2)
}
   0x8   :  { %s116_s18 = scalar_lea.vmem %s17_s10, 256  ;;  %p121_p4 = scmp.lt.s32.totalorder %s17_s10, %s17_s10 }
   0x9   :  { %p117_p3 = scmp.ne.s32.totalorder %s17_s10, %s116_s18  ;;  %p122_p5 = scmp.lt.s32.totalorder %s116_s18, %s116_s18 }
   0xb   :  { %p123_p6 = por %p122_p5, %p121_p4 }
   0xd   :  { %p124_p7 = pnand %p123_p6, %p117_p3 }
   0xf   :  { %127 = shalt.err (!%p124_p7)
}
  0x10   :  { %s155_s19 = smov 64   ;;  %s156_s20 = smov 4  }
  0x11   :  { %22 = dma.hbm_to_vmem [thread:$0]  %s229_s1, 256, %s17_s10, [#allocation3], %s155_s19, %s155_s19, %s156_s20  }
  0x12   :  { %150 = dma.done.wait [#allocation3], 256  }
  0x13   :  { %151 = vsyncadd [#allocation3], 4294967040  ;;  %v157_v0 = vmov 0   ;;  %v32_v1 = vld [vmem:[%s228_s0 + $0x2] sm:$0x1]  ;;  %v39_v5 = vlaneseq }
  0x14   :  { %105 = vset.pattern.permute.xlu1 %v157_v0  ;;  %104 = vset.pattern.permute.xlu0 %v157_v0  ;;  %v30_v2 = vld [vmem:[%s228_s0] sm:$0x1]  ;;  %v33_v3 = vld [vmem:[%s228_s0 + $0x3] sm:$0x1]  ;;  %v31_v4 = vld [vmem:[%s228_s0 + $0x1] sm:$0x1] }
  0x15   :  { %54 = vperm.xlu1 %105, %v32_v1   ;;  %36 = vperm.xlu0 %104, %v30_v2   ;;  %v40_v6 = vshrl.u32 %v39_v5, 7  ;;  %v28_v9 = vld [vmem:[#allocation2 + $0x8] sm:$0xf]  ;;  %v26_v11 = vld [vmem:[#allocation2] sm:$0xf]  ;;  %vm201_vm0 = vcmp.lt.s32.totalorder %v39_v5, 512 }
  0x16   :  { %v29_v18 = vld [vmem:[#allocation2 + $0xc] sm:$0xf]  ;;  %v27_v20 = vld [vmem:[#allocation2 + $0x4] sm:$0xf]  ;;  %s158_s0 = smov [#allocation5]  }
  0x17   :  { %v41_v7 = vsub.s32 0, %v40_v6  ;;  %s87_s30 = sshll.u32 %s158_s0, 4  ;;  %s88_s30 = int_to_ptr.vmem [resolvable:$true] %s87_s30 }
  0x18   :  { %s128_s3 = scalar_lea.vmem %s88_s30, 256  ;;  %p133_p9 = scmp.lt.s32.totalorder %s88_s30, %s88_s30 }
  0x19   :  { %63 = vperm.xlu1 %105, %v33_v3   ;;  %45 = vperm.xlu0 %104, %v31_v4   ;;  %p129_p8 = scmp.ne.s32.totalorder %s88_s30, %s128_s3  ;;  %p134_p10 = scmp.lt.s32.totalorder %s128_s3, %s128_s3 }
  0x1b   :  { %p135_p11 = por %p134_p10, %p133_p9 }
  0x1d   :  { %p136_p12 = pnand %p135_p11, %p129_p8 }
  0x94   :  { %v55_v8 = vpop.permute.xlu1 %54  ;;  %v37_v10 = vpop.permute.xlu0 %36 }
  0x95   :  { %v60_v12 = vrot.slane %v55_v8, %v41_v7  ;;  %v42_v13 = vrot.slane %v37_v10, %v41_v7 }
  0x97   :  { %v72_v15 = vmul.f32 %v60_v12, %v28_v9  ;;  %v70_v16 = vmul.f32 %v42_v13, %v26_v11 }
  0x98   :  { %v64_v17 = vpop.permute.xlu1 %63  ;;  %v46_v19 = vpop.permute.xlu0 %45 }
  0x99   :  { %80 = vst.msk [vmem:[#allocation5 + $0x8] sm:$0xf] %vm201_vm0, %v72_v15  ;;  %78 = vst.msk [vmem:[#allocation5] sm:$0xf] %vm201_vm0, %v70_v16  ;;  %v69_v21 = vrot.slane %v64_v17, %v41_v7  ;;  %v51_v22 = vrot.slane %v46_v19, %v41_v7 }
  0x9b   :  { %v73_v23 = vmul.f32 %v69_v21, %v29_v18  ;;  %v71_v24 = vmul.f32 %v51_v22, %v27_v20 }
  0x9d   :  { %81 = vst.msk [vmem:[#allocation5 + $0xc] sm:$0xf] %vm201_vm0, %v73_v23  ;;  %79 = vst.msk [vmem:[#allocation5 + $0x4] sm:$0xf] %vm201_vm0, %v71_v24 }
  0x9e   :  { %139 = shalt.err (!%p136_p12)
}
  0x9f   :  { %s140_s6 = scalar_lea.hbm %s230_s2, 256 }
  0xa0   :  { %p141_p13 = scmp.ne.s32.totalorder %s230_s2, %s140_s6  ;;  %p144_p0 = scmp.lt.u32.totalorder %s140_s6, %s230_s2 }
  0xa2   :  { %p146_p1 = pnand %p144_p0, %p141_p13 }
  0xa4   :  { %149 = shalt.err (!%p146_p1)
}
  0xa5   :  { %93 = dma.vmem_to_hbm [thread:$0]  %s88_s30, 256, %s230_s2, [#allocation4], %s155_s19, %s155_s19, %s156_s20  }
  0xa6   :  { %152 = dma.done.wait [#allocation4], 256  }
  0xa7   :  { %153 = vsyncadd [#allocation4], 4294967040 }
  0xa8   :  { %97 = vsyncpa [#allocation3], 1 }
  0xa9   :  { %98 = vsyncpa [#allocation4], 1 }

</bundles_post_ra>
